<compile_context>
chip_gen: v6e
topology: v6e:2x2x1
jax: 0.10.0
libtpu: 0.0.40
codegen_flags: <defaults>
</compile_context>

<pallas_src>
import jax
import jax.numpy as jnp
from jax.experimental import pallas as pl
from jax.experimental.pallas import tpu as pltpu


def _round_up(x, m):
    return ((x + m - 1) // m) * m


def _make_kernel(Nn, Nc, K, O):
    """Build the kernel body for static column counts (handles Nc == 0)."""

    if Nc > 0:
        def kernel(x_num_t_ref, x_cat_t_ref, wn_t_ref, we_t_ref, bias_ref, out_ref):
            tm = x_num_t_ref.shape[1]
            # numerical contribution: [O, Nn] @ [Nn, tm] -> [O, tm] (batch on lanes)
            acc = jnp.dot(wn_t_ref[...], x_num_t_ref[...],
                          preferred_element_type=jnp.float32)
            # categorical columns: per-column [K, tm] one-hot from ONE hoisted iota
            iota_k = jax.lax.broadcasted_iota(jnp.int32, (K, tm), 0)
            for c in range(Nc):                       # tiny static loop (Nc columns)
                onehot_c = (iota_k == x_cat_t_ref[c:c + 1, :]).astype(jnp.float32)
                w_c = we_t_ref[:, c * K:(c + 1) * K]  # [O, K] static lane slice
                acc = acc + jnp.dot(w_c, onehot_c,
                                    preferred_element_type=jnp.float32)
            out_ref[...] = (acc + bias_ref[...]).astype(out_ref.dtype)
    else:
        def kernel(x_num_t_ref, wn_t_ref, bias_ref, out_ref):
            acc = jnp.dot(wn_t_ref[...], x_num_t_ref[...],
                          preferred_element_type=jnp.float32)
            out_ref[...] = (acc + bias_ref[...]).astype(out_ref.dtype)

    return kernel


def fold_params(mean, std, w_num, b_num, emb, w_out, b_out):
    """One-time static parameter folding (exact affine composition).

    Folds (x-mean)/std into the numerical weights, sums per-column biases,
    folds the 1/(Nn+Nc) mean-pool scale, and composes with the output Linear.
    NOTE: assumes std entries are non-zero (as in pytorch_frame col_stats).
    """
    Nn, C = w_num.shape
    O = w_out.shape[1]
    Nc = emb.shape[0] if (emb is not None and emb.size) else 0
    K = emb.shape[1] if Nc else 0
    scale = 1.0 / float(Nn + Nc)

    inv_std = (1.0 / std).reshape(Nn)
    w_num_eff = w_num * inv_std[:, None]                                     # [Nn, C]
    bias_c = jnp.sum(b_num, axis=0) - (mean.reshape(Nn) * inv_std) @ w_num   # [C]

    wn_t = ((w_num_eff @ w_out) * scale).T                                   # [O, Nn]
    bias_fold = ((bias_c @ w_out) * scale + b_out.reshape(-1)).reshape(O, 1)  # [O, 1]
    if Nc:
        we_t = ((emb.reshape(Nc * K, C) @ w_out) * scale).T                  # [O, Nc*K]
    else:
        we_t = jnp.zeros((O, 0), jnp.float32)
    return wn_t, we_t, bias_fold


def simple_model_forward(x_num, x_cat, wn_t, we_t, bias_fold,
                         task_type="regression"):
    B, Nn = x_num.shape
    O = wn_t.shape[0]
    Nc = 0 if x_cat is None else x_cat.shape[1]
    K = (we_t.shape[1] // Nc) if Nc else 0

    # ---- batch tile: few fat tiles amortize the ~0.35us per-grid-step cost ----
    # When tiling (B > 256) the tile must be a multiple of 128 so the lane-dense
    # [*, tm] blocks stay (8,128)-legal; keep >=2 tiles so v7x's two TensorCores
    # both get work (grid axis marked "parallel"). Small B -> one full tile.
    TM_MAX = 1024
    if B <= 256:
        tm = B
    else:
        tm = min(TM_MAX, _round_up(pl.cdiv(B, 2), 128))
    grid = (pl.cdiv(B, tm),)

    tiled = lambda i: (0, i)        # batch lives on the lane (last) axis
    resident = lambda i: (0, 0)     # folded weights stay VMEM-resident across tiles

    # layout plumbing: feed inputs batch-on-lanes (lane-dense loads)
    x_num_t = x_num.T                                   # [Nn, B]
    kernel = _make_kernel(Nn, Nc, K, O)

    if Nc:
        x_cat_t = x_cat.T                               # [Nc, B]
        in_specs = [
            pl.BlockSpec((Nn, tm), tiled),              # x_num^T (batch-tiled)
            pl.BlockSpec((Nc, tm), tiled),              # x_cat^T (batch-tiled)
            pl.BlockSpec((O, Nn), resident),            # folded numerical weights
            pl.BlockSpec((O, Nc * K), resident),        # folded embedding weights
            pl.BlockSpec((O, 1), resident),             # folded bias
        ]
        args = (x_num_t, x_cat_t, wn_t, we_t, bias_fold)
    else:
        in_specs = [
            pl.BlockSpec((Nn, tm), tiled),
            pl.BlockSpec((O, Nn), resident),
            pl.BlockSpec((O, 1), resident),
        ]
        args = (x_num_t, wn_t, bias_fold)

    out_ob = pl.pallas_call(
        kernel,
        out_shape=jax.ShapeDtypeStruct((O, B), jnp.float32),
        grid=grid,
        in_specs=in_specs,
        out_specs=pl.BlockSpec((O, tm), tiled),         # lane-dense output stores
        compiler_params=pltpu.CompilerParams(
            dimension_semantics=("parallel",)),
    )(*args)

    out = out_ob.T                                      # [B, O]
    if task_type in ("binary", "regression"):
        out = jnp.squeeze(out, axis=-1)
    return out


if __name__ == "__main__":
    # Small shapes consistent with the module's forward.
    B = 8            # batch
    Nn = 3           # numerical columns
    Nc = 2           # categorical columns
    K = 4            # categories per categorical column
    C = 32           # channels
    O = 1            # num_outputs (regression -> squeeze(-1))

    key = jax.random.PRNGKey(0)
    ks = jax.random.split(key, 8)

    # inputs (the "TensorFrame" feature tensors)
    x_num = jax.random.normal(ks[0], (B, Nn), dtype=jnp.float32)
    x_cat = jax.random.randint(ks[1], (B, Nc), 0, K, dtype=jnp.int32)

    # col_stats for numerical columns (mean / std), shaped [1, Nn]
    mean = jax.random.normal(ks[2], (1, Nn), dtype=jnp.float32) * 0.1
    std = jnp.abs(jax.random.normal(ks[3], (1, Nn), dtype=jnp.float32)) + 1.0

    # LinearEncoder params: per-numerical-column weight/bias -> channels
    w_num = jax.random.normal(ks[4], (Nn, C), dtype=jnp.float32) * 0.1
    b_num = jax.random.normal(ks[5], (Nn, C), dtype=jnp.float32) * 0.1

    # EmbeddingEncoder params: per-categorical-column embedding tables
    emb = jax.random.normal(ks[6], (Nc, K, C), dtype=jnp.float32) * 0.1

    # output Linear(channels, num_outputs), stored as [C, O]
    w_out = jax.random.normal(ks[7], (C, O), dtype=jnp.float32) * 0.1
    b_out = jnp.zeros((1, O), dtype=jnp.float32)

    # one-time static parameter folding (done once, outside the per-call path)
    wn_t, we_t, bias_fold = fold_params(mean, std, w_num, b_num, emb, w_out, b_out)

    out = simple_model_forward(x_num, x_cat, wn_t, we_t, bias_fold,
                               task_type="regression")
    out = jax.block_until_ready(out)

    # pure-JAX reference of the ORIGINAL (unfused) forward
    x_norm = (x_num - mean) / std
    enc_num = x_norm[:, :, None] * w_num[None, :, :] + b_num[None, :, :]      # [B, Nn, C]
    enc_cat = jnp.stack([emb[c][x_cat[:, c]] for c in range(Nc)], axis=1)     # [B, Nc, C]
    x_full = jnp.concatenate([enc_num, enc_cat], axis=1)                      # [B, Nn+Nc, C]
    ref = (x_full.mean(axis=1) @ w_out + b_out).squeeze(-1)

    assert out.shape == (B,)
    assert jnp.allclose(out, ref, atol=1e-5, rtol=1e-4), (out, ref)

    print("KERNEL_OK")
</pallas_src>

<mosaic_0001>
module attributes {stable_mosaic.version = 11 : i64} {
  func.func @kernel(%arg0: i32, %arg1: memref<3x8xf32, #tpu.memory_space<vmem>>, %arg2: memref<2x8xi32, #tpu.memory_space<vmem>>, %arg3: memref<1x3xf32, #tpu.memory_space<vmem>>, %arg4: memref<1x8xf32, #tpu.memory_space<vmem>>, %arg5: memref<1x1xf32, #tpu.memory_space<vmem>>, %arg6: memref<1x8xf32, #tpu.memory_space<vmem>>) attributes {dimension_semantics = [#tpu.dimension_semantics<parallel>], iteration_bounds = array<i64: 1>, scalar_prefetch = 0 : i64, scratch_operands = 0 : i64, tpu.core_type = #tpu.core_type<tc>, window_params = [{transform_indices = @transform_0, window_bounds = array<i64: 3, 8>}, {transform_indices = @transform_1, window_bounds = array<i64: 2, 8>}, {pipeline_mode = #tpu.pipeline_mode<synchronous>, transform_indices = @transform_2, window_bounds = array<i64: 1, 3>}, {pipeline_mode = #tpu.pipeline_mode<synchronous>, transform_indices = @transform_3, window_bounds = array<i64: 1, 8>}, {pipeline_mode = #tpu.pipeline_mode<synchronous>, transform_indices = @transform_4, window_bounds = array<i64: 1, 1>}, {transform_indices = @transform_5, window_bounds = array<i64: 1, 8>}]} {
    %c0 = arith.constant 0 : index
    %c0_0 = arith.constant 0 : index
    %0 = vector.load %arg3[%c0, %c0_0] : memref<1x3xf32, #tpu.memory_space<vmem>>, vector<1x3xf32>
    %c0_1 = arith.constant 0 : index
    %c0_2 = arith.constant 0 : index
    %1 = vector.load %arg1[%c0_1, %c0_2] : memref<3x8xf32, #tpu.memory_space<vmem>>, vector<3x8xf32>
    %cst = arith.constant dense<0.000000e+00> : vector<1x8xf32>
    %2 = tpu.matmul %0, %1, %cst {dimension_numbers = #tpu.dot_dimension_numbers<[1], [0], [0], [1], [0, 0, 1, 1], [], []>} : vector<1x3xf32>, vector<3x8xf32>, vector<1x8xf32> -> vector<1x8xf32>
    %3 = tpu.iota {dimensions = array<i32: 0>} : vector<4x8xi32>
    %c0_3 = arith.constant 0 : index
    %c0_4 = arith.constant 0 : index
    %4 = vector.load %arg2[%c0_3, %c0_4] : memref<2x8xi32, #tpu.memory_space<vmem>>, vector<1x8xi32>
    %5 = vector.broadcast %4 : vector<1x8xi32> to vector<4x8xi32>
    %6 = arith.cmpi eq, %3, %5 : vector<4x8xi32>
    %7 = arith.extui %6 : vector<4x8xi1> to vector<4x8xi32>
    %8 = arith.sitofp %7 : vector<4x8xi32> to vector<4x8xf32>
    %c0_5 = arith.constant 0 : index
    %c0_6 = arith.constant 0 : index
    %9 = vector.load %arg4[%c0_5, %c0_6] : memref<1x8xf32, #tpu.memory_space<vmem>>, vector<1x4xf32>
    %cst_7 = arith.constant dense<0.000000e+00> : vector<1x8xf32>
    %10 = tpu.matmul %9, %8, %cst_7 {dimension_numbers = #tpu.dot_dimension_numbers<[1], [0], [0], [1], [0, 0, 1, 1], [], []>} : vector<1x4xf32>, vector<4x8xf32>, vector<1x8xf32> -> vector<1x8xf32>
    %11 = arith.addf %2, %10 : vector<1x8xf32>
    %c1 = arith.constant 1 : index
    %c0_8 = arith.constant 0 : index
    %12 = vector.load %arg2[%c1, %c0_8] : memref<2x8xi32, #tpu.memory_space<vmem>>, vector<1x8xi32>
    %13 = vector.broadcast %12 : vector<1x8xi32> to vector<4x8xi32>
    %14 = arith.cmpi eq, %3, %13 : vector<4x8xi32>
    %15 = arith.extui %14 : vector<4x8xi1> to vector<4x8xi32>
    %16 = arith.sitofp %15 : vector<4x8xi32> to vector<4x8xf32>
    %c0_9 = arith.constant 0 : index
    %c4 = arith.constant 4 : index
    %17 = vector.load %arg4[%c0_9, %c4] : memref<1x8xf32, #tpu.memory_space<vmem>>, vector<1x4xf32>
    %cst_10 = arith.constant dense<0.000000e+00> : vector<1x8xf32>
    %18 = tpu.matmul %17, %16, %cst_10 {dimension_numbers = #tpu.dot_dimension_numbers<[1], [0], [0], [1], [0, 0, 1, 1], [], []>} : vector<1x4xf32>, vector<4x8xf32>, vector<1x8xf32> -> vector<1x8xf32>
    %19 = arith.addf %11, %18 : vector<1x8xf32>
    %c0_11 = arith.constant 0 : index
    %c0_12 = arith.constant 0 : index
    %20 = vector.load %arg5[%c0_11, %c0_12] : memref<1x1xf32, #tpu.memory_space<vmem>>, vector<1x1xf32>
    %21 = vector.broadcast %20 : vector<1x1xf32> to vector<1x8xf32>
    %22 = arith.addf %19, %21 : vector<1x8xf32>
    %c0_13 = arith.constant 0 : index
    %c0_14 = arith.constant 0 : index
    %23 = vector.load %arg6[%c0_13, %c0_14] : memref<1x8xf32, #tpu.memory_space<vmem>>, vector<1x8xf32>
    tpu.vector_store %arg6[%c0_13, %c0_14], %22 {strides = array<i32>} : memref<1x8xf32, #tpu.memory_space<vmem>>, vector<1x8xf32>,
    return
  }
  func.func @transform_0(%arg0: i32) -> (i32, i32) {
    %c0_i32 = arith.constant 0 : i32
    %c0_i32_0 = arith.constant 0 : i32
    return %c0_i32, %arg0 : i32, i32
  }
  func.func @transform_1(%arg0: i32) -> (i32, i32) {
    %c0_i32 = arith.constant 0 : i32
    %c0_i32_0 = arith.constant 0 : i32
    return %c0_i32, %arg0 : i32, i32
  }
  func.func @transform_2(%arg0: i32) -> (i32, i32) {
    %c0_i32 = arith.constant 0 : i32
    %c0_i32_0 = arith.constant 0 : i32
    %c0_i32_1 = arith.constant 0 : i32
    return %c0_i32, %c0_i32_0 : i32, i32
  }
  func.func @transform_3(%arg0: i32) -> (i32, i32) {
    %c0_i32 = arith.constant 0 : i32
    %c0_i32_0 = arith.constant 0 : i32
    %c0_i32_1 = arith.constant 0 : i32
    return %c0_i32, %c0_i32_0 : i32, i32
  }
  func.func @transform_4(%arg0: i32) -> (i32, i32) {
    %c0_i32 = arith.constant 0 : i32
    %c0_i32_0 = arith.constant 0 : i32
    %c0_i32_1 = arith.constant 0 : i32
    return %c0_i32, %c0_i32_0 : i32, i32
  }
  func.func @transform_5(%arg0: i32) -> (i32, i32) {
    %c0_i32 = arith.constant 0 : i32
    %c0_i32_0 = arith.constant 0 : i32
    return %c0_i32, %arg0 : i32, i32
  }
}

</mosaic_0001>

<bundles_post_ra>
// kernel: tpu_custom_call.1
= control target key start
LH: loop header
LB: loop body
LE: loop exit
PB: predicated region body
PF: predicated region fallthrough
CT: control target
= control target key end

     0   :  { %s468_s0 = inlined_call_operand.hbm [shape: f32[3,8], index: 0, kind: input, shape index: {}]   ;;  %s469_s1 = inlined_call_operand.vmem [shape: s32[2,8], index: 1, kind: input, shape index: {}]   ;;  %s470_s2 = inlined_call_operand.vmem [shape: f32[1,3], index: 2, kind: input, shape index: {}]   ;;  %s471_s3 = inlined_call_operand.vmem [shape: f32[1,8], index: 3, kind: input, shape index: {}]   ;;  %s472_s4 = inlined_call_operand.<no memory space> [shape: f32[1,1], index: 4, kind: input, shape index: {}]   ;;  %s473_s5 = inlined_call_operand.hbm [shape: f32[1,8], index: 5, kind: output, shape index: {}]  }
   0x1   :  { %v10_v0 = vstv %s472_s4 }
   0x2   :  { %11 = vst [vmem:[#allocation2] sm:$0x1] %v10_v0 }
   0x3   :  { %12 = vsyncpa [#allocation4], 0 }
   0x4   :  { %13 = vsyncpa [#allocation5], 0  ;;  %s404_s20 = smov [#allocation3]  }
   0x5   :  { %s20_s21 = sshll.u32 %s404_s20, 4  ;;  %s21_s21 = int_to_ptr.vmem [resolvable:$true] %s20_s21 }
   0x6   :  { %s368_s22 = scalar_lea.vmem %s21_s21, 64  ;;  %p373_p1 = scmp.lt.s32.totalorder %s21_s21, %s21_s21 }
   0x7   :  { %p369_p0 = scmp.ne.s32.totalorder %s21_s21, %s368_s22  ;;  %p374_p2 = scmp.lt.s32.totalorder %s368_s22, %s368_s22 }
   0x9   :  { %p375_p3 = por %p374_p2, %p373_p1 }
   0xb   :  { %p376_p4 = pnand %p375_p3, %p369_p0 }
   0xd   :  { %379 = shalt.err (!%p376_p4)
}
   0xe   :  { %23 = dma.hbm_to_vmem [thread:$0]  %s468_s0, 64, %s21_s21, [#allocation4]  }
   0xf   :  { %400 = dma.done.wait [#allocation4], 64  }
  0x10   :  { %401 = vsyncadd [#allocation4], 4294967232  ;;  %v37_v1 = vlaneseq  ;;  %v405_v2 = vmov 0.0   ;;  %vm406_vm0 = vmmov 0   ;;  %v407_v4 = vmov 0  }
  0x11   :  { %338 = vmatprep.subr.mxu0 %v405_v2  ;;  %340 = vmatprep.mubr.msk.f32.mxu0 %vm406_vm0, %v405_v2  ;;  %vm130_vm1 = vcmask 1042432   ;;  %vm52_vm2 = vcmask 1043456   ;;  %vm126_vm3 = vcmask 23552   ;;  %v47_v6 = vld [vmem:[%s471_s3] sm:$0x1]  ;;  %vm48_vm5 = vcmask 31744  }
  0x12   :  { %v38_v3 = vshrl.u32 %v37_v1, 7  ;;  %343 = vmatprep.subr.mxu1 %v405_v2  ;;  %345 = vmatprep.mubr.msk.f32.mxu1 %vm406_vm0, %v405_v2  ;;  %v322_v7 = vld [vmem:[%s469_s1] ss:$0 sm:$0xff]  ;;  %v36_v8 = vld [vmem:[#allocation3] sm:$0x7]  ;;  %s408_s3 = smov 124  }
  0x13   :  { %359 = vset.pattern.permute.xlu0 %v407_v4  ;;  %344 = vmatpush3.msk.msra.mxu1 %vm130_vm1, %v36_v8  ;;  %v35_v10 = vld [vmem:[%s470_s2] sm:$0x1]  ;;  %v328_v11 = vld [vmem:[%s469_s1 + $0x1] ss:$0 sm:$0xff]  ;;  %s409_s1 = smov [#allocation6]   ;;  %vm305_vm7 = vcmask 57344  }
  0x14   :  { %v214_v5 = vsub.s32 0, %v38_v3  ;;  %vm44_vm4 = vcmp.eq.s32.totalorder %v38_v3, %v322_v7  ;;  %346 = vmatmul.mubr.msk.f32.vlgmr.msra.gmra.mxu1 %vm126_vm3, %v35_v10  ;;  %vm209_vm6 = vcmp.eq.s32.totalorder %v38_v3, %v328_v11  ;;  %v294_v14 = vld [vmem:[#allocation2] sm:$0x1]  ;;  %s313_s2 = sshll.u32 %s409_s1, 4  ;;  %s314_s2 = int_to_ptr.vmem [resolvable:$true] %s313_s2 }
  0x15   :  { %v323_v12 = vsel %vm44_vm4, 1.0, %v405_v2  ;;  %v329_v13 = vsel %vm209_vm6, 1.0, %v405_v2  ;;  %s380_s6 = scalar_lea.vmem %s314_s2, 16  ;;  %s384_s7 = scalar_lea.vmem %s314_s2, 32 }
  0x16   :  { %v215_v9 = vrot.slane %v47_v6, %v214_v5  ;;  %339 = vmatpush3.msk.msra.mxu0 %vm52_vm2, %v323_v12  ;;  %p381_p5 = scmp.ne.s32.totalorder %s314_s2, %s380_s6  ;;  %p385_p6 = scmp.lt.s32.totalorder %s314_s2, %s314_s2 }
  0x17   :  { %341 = vmatmul.mubr.msk.f32.vlgmr.msra.gmra.mxu0 %vm48_vm5, %v47_v6  ;;  %348 = vmatprep.subr.mxu0 %v405_v2  ;;  %p386_p7 = scmp.lt.s32.totalorder %s384_s7, %s380_s6 }
  0x18   :  { %216 = vrot.lane.b32.xlu0 %v215_v9, %s408_s3  ;;  %349 = vmatpush3.msk.msra.mxu0 %vm52_vm2, %v329_v13 }
  0x19   :  { %350 = vmatprep.mubr.msk.f32.mxu0 %vm406_vm0, %v405_v2  ;;  %p387_p8 = por %p386_p7, %p385_p6 }
  0x1b   :  { %p388_p9 = pnand %p387_p8, %p381_p5 }
  0x1c   :  { %297 = vperm.xlu0 %359, %v294_v14  }
  0x8a   :  { %v217_v15 = vpop.permute.xlu0 %216 }
  0x8b   :  { %351 = vmatmul.mubr.msk.f32.vlgmr.msra.gmra.mxu0 %vm48_vm5, %v217_v15 }
  0x97   :  { %v298_v21 = vpop.permute.xlu0 %297 }
  0x98   :  { %v303_v22 = vrot.slane %v298_v21, %v214_v5 }
  0xd4   :  { %v200_v16 = vpop.f32.mrf.mxu1 }
  0xd6   :  { %v347_v18 = vpop.f32.mrf.mxu1 }
  0xd7   :  { %v122_v17 = vpop.f32.mrf.mxu0 }
  0xd8   :  { %v201_v19 = vadd.f32 %v200_v16, %v122_v17 }
  0xd9   :  { %v342_v20 = vpop.f32.mrf.mxu0 }
 0x14b   :  { %v289_v23 = vpop.f32.mrf.mxu0 }
 0x14c   :  { %v293_v24 = vadd.f32 %v289_v23, %v201_v19 }
 0x14d   :  { %v352_v25 = vpop.f32.mrf.mxu0 }
 0x14e   :  { %v304_v26 = vadd.f32 %v303_v22, %v293_v24 }
 0x150   :  { %306 = vst.msk [vmem:[#allocation6] sm:$0x1] %vm305_vm7, %v304_v26 }
 0x151   :  { %391 = shalt.err (!%p388_p9)
}
 0x152   :  { %316 = dma.vmem_to_hbm [thread:$0]  %s314_s2, 16, %s473_s5, [#allocation5]  }
 0x153   :  { %402 = dma.done.wait [#allocation5], 16  }
 0x154   :  { %403 = vsyncadd [#allocation5], 4294967280 }
 0x155   :  { %320 = vsyncpa [#allocation4], 1 }
 0x156   :  { %321 = vsyncpa [#allocation5], 1 }

</bundles_post_ra>
